<compile_context>
chip_gen: v7x
topology: tpu7x:2x2x1
jax: 0.10.0
libtpu: 0.0.40
codegen_flags: <defaults>
</compile_context>

<pallas_src>
import functools

import jax
import jax.numpy as jnp
import numpy as np
from jax.experimental import pallas as pl
from jax.experimental.pallas import tpu as pltpu


def _round_up(x, m):
    return (x + m - 1) // m * m


def _conv_relu_kernel(x_ref, w_ref, b_ref, o_ref, xpad_ref, p_ref, *,
                      H, W, Wp, padding, tap_offsets, s_pad, nb):
    """Fused pad + im2col-pack + single-GEMM conv + bias + ReLU.

    x_ref   : (Nb, Cin, H*W)        f32   raw images, spatial flattened (row-major)
    w_ref   : (Cout, KH*KW*Cin)     bf16  2-D weight slab (resident)
    b_ref   : (Cout, 1)             f32   bias (resident)
    o_ref   : (Nb, Cout, S_pad)           output, spatial in lanes (lane-dense)
    xpad_ref: (Nb, Cin, Lin)        bf16  scratch: zero-padded flat image
    p_ref   : (KH*KW*Cin, Nb*S_pad) bf16  scratch: stacked shifted slabs (GEMM K dim)
    """
    cin = x_ref.shape[1]

    # 1) Build the zero-padded, flattened image(s) in VMEM (padding + compute-dtype
    #    cast folded into the kernel; no padded copy ever touches HBM).
    xpad_ref[...] = jnp.zeros_like(xpad_ref)
    for i in range(nb):
        for h in range(H):
            dst = (h + padding) * Wp + padding
            xpad_ref[i, :, dst:dst + W] = (
                x_ref[i, :, h * W:(h + 1) * W].astype(xpad_ref.dtype))

    # 2) Pack the KH*KW lane-shifted views of the resident padded image into one
    #    (K, Nb*S_pad) operand.  This is the single explicit, schedulable shift/copy
    #    pass that replaces 9 per-tap unaligned slices feeding 9 tiny matmuls.
    for i in range(nb):
        for t, off in enumerate(tap_offsets):
            p_ref[t * cin:(t + 1) * cin, i * s_pad:(i + 1) * s_pad] = (
                xpad_ref[i, :, off:off + s_pad])

    # 3) One MXU matmul with K = KH*KW*Cin, f32 accumulation, f32 epilogue.
    acc = jnp.dot(w_ref[...], p_ref[...], preferred_element_type=jnp.float32)
    y = jnp.maximum(acc + b_ref[...], 0.0).astype(o_ref.dtype)
    for i in range(nb):
        o_ref[i] = y[:, i * s_pad:(i + 1) * s_pad]   # lane-aligned (S_pad % 128 == 0)


def conv_module_forward(x, weight, bias, *, stride=1, padding=1,
                        compute_dtype=jnp.bfloat16, images_per_step=1):
    """ConvModule.forward with defaults: order=('conv','norm','act'), norm_cfg=None
    (=> no norm, conv bias=True), act=ReLU, padding_mode='zeros'.

    compute_dtype is an explicit choice: bf16 operands (MXU-native) with f32
    accumulation/epilogue; pass jnp.float32 for strict-fp32 PyTorch numerics.
    """
    N, Cin, H, W = x.shape
    Cout, Cin_w, KH, KW = weight.shape
    assert Cin == Cin_w
    # TODO(synk): stride>1 / dilation>1 / groups>1 / reflect-circular padding modes
    # and the optional norm / spectral-norm branches of ConvModule are not lowered
    # (module defaults: stride=1, dilation=1, groups=1, padding_mode='zeros', no norm).
    assert stride == 1
    nb = images_per_step
    assert N % nb == 0

    Hp, Wp = H + 2 * padding, W + 2 * padding
    Hout, Wout = Hp - KH + 1, Wp - KW + 1
    S = Hout * Wp                      # Wp cols computed per row; last KW-1 are garbage
    S_pad = _round_up(S, 128)          # lane-dense, unmasked output stores
    tap_offsets = tuple(kh * Wp + kw for kh in range(KH) for kw in range(KW))
    Lin = _round_up(max(tap_offsets) + S_pad, 128)   # tap slices stay in bounds
    K = KH * KW * Cin

    # Free contiguous reshape only -- no padded/cast copy of x is written to HBM.
    xf = x.reshape(N, Cin, H * W)
    # (Cout, KH*KW*Cin): column (kh*KW + kw)*Cin + c  <->  weight[o, c, kh, kw].
    wk = jnp.transpose(weight, (0, 2, 3, 1)).reshape(Cout, K).astype(compute_dtype)
    b2 = bias.reshape(Cout, 1).astype(jnp.float32)

    kernel = functools.partial(
        _conv_relu_kernel, H=H, W=W, Wp=Wp, padding=padding,
        tap_offsets=tap_offsets, s_pad=S_pad, nb=nb)

    out = pl.pallas_call(
        kernel,
        out_shape=jax.ShapeDtypeStruct((N, Cout, S_pad), x.dtype),
        grid_spec=pltpu.PrefetchScalarGridSpec(
            num_scalar_prefetch=0,
            grid=(N // nb,),                               # parallel across TCs (v7x)
            in_specs=[
                pl.BlockSpec((nb, Cin, H * W), lambda n: (n, 0, 0)),  # raw images
                pl.BlockSpec((Cout, K), lambda n: (0, 0)),            # 2-D weight slab
                pl.BlockSpec((Cout, 1), lambda n: (0, 0)),            # bias
            ],
            out_specs=pl.BlockSpec((nb, Cout, S_pad), lambda n: (n, 0, 0)),
            scratch_shapes=[
                pltpu.VMEM((nb, Cin, Lin), compute_dtype),        # padded flat image
                pltpu.VMEM((K, nb * S_pad), compute_dtype),       # stacked GEMM operand
            ],
        ),
        compiler_params=pltpu.CompilerParams(
            dimension_semantics=("parallel",)),
    )(xf, wk, b2)

    # (N, Cout, S_pad): drop the lane padding + KW-1 garbage cols per row; already
    # NCHW-ordered, so no post-kernel transpose.
    y = out[:, :, :S].reshape(N, Cout, Hout, Wp)[:, :, :, :Wout]
    return y


if __name__ == "__main__":
    # ConvModule(in_channels=4, out_channels=8, kernel_size=3, padding=1)
    N, Cin, H, W = 2, 4, 16, 16
    Cout, KH, KW = 8, 3, 3
    stride, padding = 1, 1

    key = jax.random.PRNGKey(0)
    kx, kw_key, kb = jax.random.split(key, 3)
    x = jax.random.normal(kx, (N, Cin, H, W), dtype=jnp.float32)

    # kaiming_init (nonlinearity='relu', a=0): std = sqrt(2 / fan_in).
    fan_in = Cin * KH * KW
    weight = jax.random.normal(kw_key, (Cout, Cin, KH, KW), dtype=jnp.float32) * \
        jnp.sqrt(2.0 / fan_in)
    # kaiming_init zero-inits the bias; use a small nonzero one so the bias path
    # in the kernel is actually exercised by the check below.
    bias = 0.1 * jax.random.normal(kb, (Cout,), dtype=jnp.float32)

    y = conv_module_forward(x, weight, bias, stride=stride, padding=padding)
    y = jax.block_until_ready(y)
    assert y.shape == (N, Cout, H, W)

    # Reference: same bf16 operand cast as the kernel, f32 accumulation, +bias, ReLU.
    ref = jax.lax.conv_general_dilated(
        x.astype(jnp.bfloat16), weight.astype(jnp.bfloat16),
        (stride, stride), [(padding, padding), (padding, padding)],
        dimension_numbers=("NCHW", "OIHW", "NCHW"),
        preferred_element_type=jnp.float32)
    ref = jnp.maximum(ref + bias[None, :, None, None], 0.0).astype(x.dtype)
    np.testing.assert_allclose(np.asarray(y), np.asarray(ref),
                               rtol=2e-2, atol=2e-2)

    print("KERNEL_OK")
</pallas_src>

<mosaic_0001>
module attributes {stable_mosaic.version = 11 : i64} {
  func.func @_conv_relu_kernel(%arg0: i32, %arg1: memref<1x4x256xf32, #tpu.memory_space<vmem>>, %arg2: memref<8x36xbf16, #tpu.memory_space<vmem>>, %arg3: memref<8x1xf32, #tpu.memory_space<vmem>>, %arg4: memref<1x8x384xf32, #tpu.memory_space<vmem>>, %arg5: memref<1x4x512xbf16, #tpu.memory_space<vmem>>, %arg6: memref<36x384xbf16, #tpu.memory_space<vmem>>) attributes {dimension_semantics = [#tpu.dimension_semantics<parallel>], iteration_bounds = array<i64: 2>, scalar_prefetch = 0 : i64, scratch_operands = 2 : i64, tpu.core_type = #tpu.core_type<tc>, window_params = [{transform_indices = @transform_0, window_bounds = array<i64: 1, 4, 256>}, {pipeline_mode = #tpu.pipeline_mode<synchronous>, transform_indices = @transform_1, window_bounds = array<i64: 8, 36>}, {pipeline_mode = #tpu.pipeline_mode<synchronous>, transform_indices = @transform_2, window_bounds = array<i64: 8, 1>}, {transform_indices = @transform_3, window_bounds = array<i64: 1, 8, 384>}]} {
    %cst = arith.constant 0.000000e+00 : bf16
    %0 = vector.broadcast %cst : bf16 to vector<1x4x512xbf16>
    %c0 = arith.constant 0 : index
    %c0_0 = arith.constant 0 : index
    %c0_1 = arith.constant 0 : index
    %1 = vector.load %arg5[%c0, %c0_0, %c0_1] : memref<1x4x512xbf16, #tpu.memory_space<vmem>>, vector<1x4x512xbf16>
    tpu.vector_store %arg5[%c0, %c0_0, %c0_1], %0 {strides = array<i32>} : memref<1x4x512xbf16, #tpu.memory_space<vmem>>, vector<1x4x512xbf16>,
    %c0_2 = arith.constant 0 : index
    %c0_3 = arith.constant 0 : index
    %c0_4 = arith.constant 0 : index
    %2 = vector.load %arg1[%c0_2, %c0_3, %c0_4] : memref<1x4x256xf32, #tpu.memory_space<vmem>>, vector<1x4x16xf32>
    %3 = vector.shape_cast %2 : vector<1x4x16xf32> to vector<4x16xf32>
    %4 = arith.truncf %3 : vector<4x16xf32> to vector<4x16xbf16>
    %c0_5 = arith.constant 0 : index
    %c0_6 = arith.constant 0 : index
    %c19 = arith.constant 19 : index
    %5 = vector.load %arg5[%c0_5, %c0_6, %c19] : memref<1x4x512xbf16, #tpu.memory_space<vmem>>, vector<1x4x16xbf16>
    %6 = vector.shape_cast %5 : vector<1x4x16xbf16> to vector<4x16xbf16>
    %7 = vector.shape_cast %4 : vector<4x16xbf16> to vector<1x4x16xbf16>
    tpu.vector_store %arg5[%c0_5, %c0_6, %c19], %7 {strides = array<i32>} : memref<1x4x512xbf16, #tpu.memory_space<vmem>>, vector<1x4x16xbf16>,
    %c0_7 = arith.constant 0 : index
    %c0_8 = arith.constant 0 : index
    %c16 = arith.constant 16 : index
    %8 = vector.load %arg1[%c0_7, %c0_8, %c16] : memref<1x4x256xf32, #tpu.memory_space<vmem>>, vector<1x4x16xf32>
    %9 = vector.shape_cast %8 : vector<1x4x16xf32> to vector<4x16xf32>
    %10 = arith.truncf %9 : vector<4x16xf32> to vector<4x16xbf16>
    %c0_9 = arith.constant 0 : index
    %c0_10 = arith.constant 0 : index
    %c37 = arith.constant 37 : index
    %11 = vector.load %arg5[%c0_9, %c0_10, %c37] : memref<1x4x512xbf16, #tpu.memory_space<vmem>>, vector<1x4x16xbf16>
    %12 = vector.shape_cast %11 : vector<1x4x16xbf16> to vector<4x16xbf16>
    %13 = vector.shape_cast %10 : vector<4x16xbf16> to vector<1x4x16xbf16>
    tpu.vector_store %arg5[%c0_9, %c0_10, %c37], %13 {strides = array<i32>} : memref<1x4x512xbf16, #tpu.memory_space<vmem>>, vector<1x4x16xbf16>,
    %c0_11 = arith.constant 0 : index
    %c0_12 = arith.constant 0 : index
    %c32 = arith.constant 32 : index
    %14 = vector.load %arg1[%c0_11, %c0_12, %c32] : memref<1x4x256xf32, #tpu.memory_space<vmem>>, vector<1x4x16xf32>
    %15 = vector.shape_cast %14 : vector<1x4x16xf32> to vector<4x16xf32>
    %16 = arith.truncf %15 : vector<4x16xf32> to vector<4x16xbf16>
    %c0_13 = arith.constant 0 : index
    %c0_14 = arith.constant 0 : index
    %c55 = arith.constant 55 : index
    %17 = vector.load %arg5[%c0_13, %c0_14, %c55] : memref<1x4x512xbf16, #tpu.memory_space<vmem>>, vector<1x4x16xbf16>
    %18 = vector.shape_cast %17 : vector<1x4x16xbf16> to vector<4x16xbf16>
    %19 = vector.shape_cast %16 : vector<4x16xbf16> to vector<1x4x16xbf16>
    tpu.vector_store %arg5[%c0_13, %c0_14, %c55], %19 {strides = array<i32>} : memref<1x4x512xbf16, #tpu.memory_space<vmem>>, vector<1x4x16xbf16>,
    %c0_15 = arith.constant 0 : index
    %c0_16 = arith.constant 0 : index
    %c48 = arith.constant 48 : index
    %20 = vector.load %arg1[%c0_15, %c0_16, %c48] : memref<1x4x256xf32, #tpu.memory_space<vmem>>, vector<1x4x16xf32>
    %21 = vector.shape_cast %20 : vector<1x4x16xf32> to vector<4x16xf32>
    %22 = arith.truncf %21 : vector<4x16xf32> to vector<4x16xbf16>
    %c0_17 = arith.constant 0 : index
    %c0_18 = arith.constant 0 : index
    %c73 = arith.constant 73 : index
    %23 = vector.load %arg5[%c0_17, %c0_18, %c73] : memref<1x4x512xbf16, #tpu.memory_space<vmem>>, vector<1x4x16xbf16>
    %24 = vector.shape_cast %23 : vector<1x4x16xbf16> to vector<4x16xbf16>
    %25 = vector.shape_cast %22 : vector<4x16xbf16> to vector<1x4x16xbf16>
    tpu.vector_store %arg5[%c0_17, %c0_18, %c73], %25 {strides = array<i32>} : memref<1x4x512xbf16, #tpu.memory_space<vmem>>, vector<1x4x16xbf16>,
    %c0_19 = arith.constant 0 : index
    %c0_20 = arith.constant 0 : index
    %c64 = arith.constant 64 : index
    %26 = vector.load %arg1[%c0_19, %c0_20, %c64] : memref<1x4x256xf32, #tpu.memory_space<vmem>>, vector<1x4x16xf32>
    %27 = vector.shape_cast %26 : vector<1x4x16xf32> to vector<4x16xf32>
    %28 = arith.truncf %27 : vector<4x16xf32> to vector<4x16xbf16>
    %c0_21 = arith.constant 0 : index
    %c0_22 = arith.constant 0 : index
    %c91 = arith.constant 91 : index
    %29 = vector.load %arg5[%c0_21, %c0_22, %c91] : memref<1x4x512xbf16, #tpu.memory_space<vmem>>, vector<1x4x16xbf16>
    %30 = vector.shape_cast %29 : vector<1x4x16xbf16> to vector<4x16xbf16>
    %31 = vector.shape_cast %28 : vector<4x16xbf16> to vector<1x4x16xbf16>
    tpu.vector_store %arg5[%c0_21, %c0_22, %c91], %31 {strides = array<i32>} : memref<1x4x512xbf16, #tpu.memory_space<vmem>>, vector<1x4x16xbf16>,
    %c0_23 = arith.constant 0 : index
    %c0_24 = arith.constant 0 : index
    %c80 = arith.constant 80 : index
    %32 = vector.load %arg1[%c0_23, %c0_24, %c80] : memref<1x4x256xf32, #tpu.memory_space<vmem>>, vector<1x4x16xf32>
    %33 = vector.shape_cast %32 : vector<1x4x16xf32> to vector<4x16xf32>
    %34 = arith.truncf %33 : vector<4x16xf32> to vector<4x16xbf16>
    %c0_25 = arith.constant 0 : index
    %c0_26 = arith.constant 0 : index
    %c109 = arith.constant 109 : index
    %35 = vector.load %arg5[%c0_25, %c0_26, %c109] : memref<1x4x512xbf16, #tpu.memory_space<vmem>>, vector<1x4x16xbf16>
    %36 = vector.shape_cast %35 : vector<1x4x16xbf16> to vector<4x16xbf16>
    %37 = vector.shape_cast %34 : vector<4x16xbf16> to vector<1x4x16xbf16>
    tpu.vector_store %arg5[%c0_25, %c0_26, %c109], %37 {strides = array<i32>} : memref<1x4x512xbf16, #tpu.memory_space<vmem>>, vector<1x4x16xbf16>,
    %c0_27 = arith.constant 0 : index
    %c0_28 = arith.constant 0 : index
    %c96 = arith.constant 96 : index
    %38 = vector.load %arg1[%c0_27, %c0_28, %c96] : memref<1x4x256xf32, #tpu.memory_space<vmem>>, vector<1x4x16xf32>
    %39 = vector.shape_cast %38 : vector<1x4x16xf32> to vector<4x16xf32>
    %40 = arith.truncf %39 : vector<4x16xf32> to vector<4x16xbf16>
    %c0_29 = arith.constant 0 : index
    %c0_30 = arith.constant 0 : index
    %c127 = arith.constant 127 : index
    %41 = vector.load %arg5[%c0_29, %c0_30, %c127] : memref<1x4x512xbf16, #tpu.memory_space<vmem>>, vector<1x4x16xbf16>
    %42 = vector.shape_cast %41 : vector<1x4x16xbf16> to vector<4x16xbf16>
    %43 = vector.shape_cast %40 : vector<4x16xbf16> to vector<1x4x16xbf16>
    tpu.vector_store %arg5[%c0_29, %c0_30, %c127], %43 {strides = array<i32>} : memref<1x4x512xbf16, #tpu.memory_space<vmem>>, vector<1x4x16xbf16>,
    %c0_31 = arith.constant 0 : index
    %c0_32 = arith.constant 0 : index
    %c112 = arith.constant 112 : index
    %44 = vector.load %arg1[%c0_31, %c0_32, %c112] : memref<1x4x256xf32, #tpu.memory_space<vmem>>, vector<1x4x16xf32>
    %45 = vector.shape_cast %44 : vector<1x4x16xf32> to vector<4x16xf32>
    %46 = arith.truncf %45 : vector<4x16xf32> to vector<4x16xbf16>
    %c0_33 = arith.constant 0 : index
    %c0_34 = arith.constant 0 : index
    %c145 = arith.constant 145 : index
    %47 = vector.load %arg5[%c0_33, %c0_34, %c145] : memref<1x4x512xbf16, #tpu.memory_space<vmem>>, vector<1x4x16xbf16>
    %48 = vector.shape_cast %47 : vector<1x4x16xbf16> to vector<4x16xbf16>
    %49 = vector.shape_cast %46 : vector<4x16xbf16> to vector<1x4x16xbf16>
    tpu.vector_store %arg5[%c0_33, %c0_34, %c145], %49 {strides = array<i32>} : memref<1x4x512xbf16, #tpu.memory_space<vmem>>, vector<1x4x16xbf16>,
    %c0_35 = arith.constant 0 : index
    %c0_36 = arith.constant 0 : index
    %c128 = arith.constant 128 : index
    %50 = vector.load %arg1[%c0_35, %c0_36, %c128] : memref<1x4x256xf32, #tpu.memory_space<vmem>>, vector<1x4x16xf32>
    %51 = vector.shape_cast %50 : vector<1x4x16xf32> to vector<4x16xf32>
    %52 = arith.truncf %51 : vector<4x16xf32> to vector<4x16xbf16>
    %c0_37 = arith.constant 0 : index
    %c0_38 = arith.constant 0 : index
    %c163 = arith.constant 163 : index
    %53 = vector.load %arg5[%c0_37, %c0_38, %c163] : memref<1x4x512xbf16, #tpu.memory_space<vmem>>, vector<1x4x16xbf16>
    %54 = vector.shape_cast %53 : vector<1x4x16xbf16> to vector<4x16xbf16>
    %55 = vector.shape_cast %52 : vector<4x16xbf16> to vector<1x4x16xbf16>
    tpu.vector_store %arg5[%c0_37, %c0_38, %c163], %55 {strides = array<i32>} : memref<1x4x512xbf16, #tpu.memory_space<vmem>>, vector<1x4x16xbf16>,
    %c0_39 = arith.constant 0 : index
    %c0_40 = arith.constant 0 : index
    %c144 = arith.constant 144 : index
    %56 = vector.load %arg1[%c0_39, %c0_40, %c144] : memref<1x4x256xf32, #tpu.memory_space<vmem>>, vector<1x4x16xf32>
    %57 = vector.shape_cast %56 : vector<1x4x16xf32> to vector<4x16xf32>
    %58 = arith.truncf %57 : vector<4x16xf32> to vector<4x16xbf16>
    %c0_41 = arith.constant 0 : index
    %c0_42 = arith.constant 0 : index
    %c181 = arith.constant 181 : index
    %59 = vector.load %arg5[%c0_41, %c0_42, %c181] : memref<1x4x512xbf16, #tpu.memory_space<vmem>>, vector<1x4x16xbf16>
    %60 = vector.shape_cast %59 : vector<1x4x16xbf16> to vector<4x16xbf16>
    %61 = vector.shape_cast %58 : vector<4x16xbf16> to vector<1x4x16xbf16>
    tpu.vector_store %arg5[%c0_41, %c0_42, %c181], %61 {strides = array<i32>} : memref<1x4x512xbf16, #tpu.memory_space<vmem>>, vector<1x4x16xbf16>,
    %c0_43 = arith.constant 0 : index
    %c0_44 = arith.constant 0 : index
    %c160 = arith.constant 160 : index
    %62 = vector.load %arg1[%c0_43, %c0_44, %c160] : memref<1x4x256xf32, #tpu.memory_space<vmem>>, vector<1x4x16xf32>
    %63 = vector.shape_cast %62 : vector<1x4x16xf32> to vector<4x16xf32>
    %64 = arith.truncf %63 : vector<4x16xf32> to vector<4x16xbf16>
    %c0_45 = arith.constant 0 : index
    %c0_46 = arith.constant 0 : index
    %c199 = arith.constant 199 : index
    %65 = vector.load %arg5[%c0_45, %c0_46, %c199] : memref<1x4x512xbf16, #tpu.memory_space<vmem>>, vector<1x4x16xbf16>
    %66 = vector.shape_cast %65 : vector<1x4x16xbf16> to vector<4x16xbf16>
    %67 = vector.shape_cast %64 : vector<4x16xbf16> to vector<1x4x16xbf16>
    tpu.vector_store %arg5[%c0_45, %c0_46, %c199], %67 {strides = array<i32>} : memref<1x4x512xbf16, #tpu.memory_space<vmem>>, vector<1x4x16xbf16>,
    %c0_47 = arith.constant 0 : index
    %c0_48 = arith.constant 0 : index
    %c176 = arith.constant 176 : index
    %68 = vector.load %arg1[%c0_47, %c0_48, %c176] : memref<1x4x256xf32, #tpu.memory_space<vmem>>, vector<1x4x16xf32>
    %69 = vector.shape_cast %68 : vector<1x4x16xf32> to vector<4x16xf32>
    %70 = arith.truncf %69 : vector<4x16xf32> to vector<4x16xbf16>
    %c0_49 = arith.constant 0 : index
    %c0_50 = arith.constant 0 : index
    %c217 = arith.constant 217 : index
    %71 = vector.load %arg5[%c0_49, %c0_50, %c217] : memref<1x4x512xbf16, #tpu.memory_space<vmem>>, vector<1x4x16xbf16>
    %72 = vector.shape_cast %71 : vector<1x4x16xbf16> to vector<4x16xbf16>
    %73 = vector.shape_cast %70 : vector<4x16xbf16> to vector<1x4x16xbf16>
    tpu.vector_store %arg5[%c0_49, %c0_50, %c217], %73 {strides = array<i32>} : memref<1x4x512xbf16, #tpu.memory_space<vmem>>, vector<1x4x16xbf16>,
    %c0_51 = arith.constant 0 : index
    %c0_52 = arith.constant 0 : index
    %c192 = arith.constant 192 : index
    %74 = vector.load %arg1[%c0_51, %c0_52, %c192] : memref<1x4x256xf32, #tpu.memory_space<vmem>>, vector<1x4x16xf32>
    %75 = vector.shape_cast %74 : vector<1x4x16xf32> to vector<4x16xf32>
    %76 = arith.truncf %75 : vector<4x16xf32> to vector<4x16xbf16>
    %c0_53 = arith.constant 0 : index
    %c0_54 = arith.constant 0 : index
    %c235 = arith.constant 235 : index
    %77 = vector.load %arg5[%c0_53, %c0_54, %c235] : memref<1x4x512xbf16, #tpu.memory_space<vmem>>, vector<1x4x16xbf16>
    %78 = vector.shape_cast %77 : vector<1x4x16xbf16> to vector<4x16xbf16>
    %79 = vector.shape_cast %76 : vector<4x16xbf16> to vector<1x4x16xbf16>
    tpu.vector_store %arg5[%c0_53, %c0_54, %c235], %79 {strides = array<i32>} : memref<1x4x512xbf16, #tpu.memory_space<vmem>>, vector<1x4x16xbf16>,
    %c0_55 = arith.constant 0 : index
    %c0_56 = arith.constant 0 : index
    %c208 = arith.constant 208 : index
    %80 = vector.load %arg1[%c0_55, %c0_56, %c208] : memref<1x4x256xf32, #tpu.memory_space<vmem>>, vector<1x4x16xf32>
    %81 = vector.shape_cast %80 : vector<1x4x16xf32> to vector<4x16xf32>
    %82 = arith.truncf %81 : vector<4x16xf32> to vector<4x16xbf16>
    %c0_57 = arith.constant 0 : index
    %c0_58 = arith.constant 0 : index
    %c253 = arith.constant 253 : index
    %83 = vector.load %arg5[%c0_57, %c0_58, %c253] : memref<1x4x512xbf16, #tpu.memory_space<vmem>>, vector<1x4x16xbf16>
    %84 = vector.shape_cast %83 : vector<1x4x16xbf16> to vector<4x16xbf16>
    %85 = vector.shape_cast %82 : vector<4x16xbf16> to vector<1x4x16xbf16>
    tpu.vector_store %arg5[%c0_57, %c0_58, %c253], %85 {strides = array<i32>} : memref<1x4x512xbf16, #tpu.memory_space<vmem>>, vector<1x4x16xbf16>,
    %c0_59 = arith.constant 0 : index
    %c0_60 = arith.constant 0 : index
    %c224 = arith.constant 224 : index
    %86 = vector.load %arg1[%c0_59, %c0_60, %c224] : memref<1x4x256xf32, #tpu.memory_space<vmem>>, vector<1x4x16xf32>
    %87 = vector.shape_cast %86 : vector<1x4x16xf32> to vector<4x16xf32>
    %88 = arith.truncf %87 : vector<4x16xf32> to vector<4x16xbf16>
    %c0_61 = arith.constant 0 : index
    %c0_62 = arith.constant 0 : index
    %c271 = arith.constant 271 : index
    %89 = vector.load %arg5[%c0_61, %c0_62, %c271] : memref<1x4x512xbf16, #tpu.memory_space<vmem>>, vector<1x4x16xbf16>
    %90 = vector.shape_cast %89 : vector<1x4x16xbf16> to vector<4x16xbf16>
    %91 = vector.shape_cast %88 : vector<4x16xbf16> to vector<1x4x16xbf16>
    tpu.vector_store %arg5[%c0_61, %c0_62, %c271], %91 {strides = array<i32>} : memref<1x4x512xbf16, #tpu.memory_space<vmem>>, vector<1x4x16xbf16>,
    %c0_63 = arith.constant 0 : index
    %c0_64 = arith.constant 0 : index
    %c240 = arith.constant 240 : index
    %92 = vector.load %arg1[%c0_63, %c0_64, %c240] : memref<1x4x256xf32, #tpu.memory_space<vmem>>, vector<1x4x16xf32>
    %93 = vector.shape_cast %92 : vector<1x4x16xf32> to vector<4x16xf32>
    %94 = arith.truncf %93 : vector<4x16xf32> to vector<4x16xbf16>
    %c0_65 = arith.constant 0 : index
    %c0_66 = arith.constant 0 : index
    %c289 = arith.constant 289 : index
    %95 = vector.load %arg5[%c0_65, %c0_66, %c289] : memref<1x4x512xbf16, #tpu.memory_space<vmem>>, vector<1x4x16xbf16>
    %96 = vector.shape_cast %95 : vector<1x4x16xbf16> to vector<4x16xbf16>
    %97 = vector.shape_cast %94 : vector<4x16xbf16> to vector<1x4x16xbf16>
    tpu.vector_store %arg5[%c0_65, %c0_66, %c289], %97 {strides = array<i32>} : memref<1x4x512xbf16, #tpu.memory_space<vmem>>, vector<1x4x16xbf16>,
    %c0_67 = arith.constant 0 : index
    %c0_68 = arith.constant 0 : index
    %c0_69 = arith.constant 0 : index
    %98 = vector.load %arg5[%c0_67, %c0_68, %c0_69] : memref<1x4x512xbf16, #tpu.memory_space<vmem>>, vector<1x4x384xbf16>
    %99 = vector.shape_cast %98 : vector<1x4x384xbf16> to vector<4x384xbf16>
    %c0_70 = arith.constant 0 : index
    %c0_71 = arith.constant 0 : index
    %100 = vector.load %arg6[%c0_70, %c0_71] : memref<36x384xbf16, #tpu.memory_space<vmem>>, vector<4x384xbf16>
    tpu.vector_store %arg6[%c0_70, %c0_71], %99 {strides = array<i32>} : memref<36x384xbf16, #tpu.memory_space<vmem>>, vector<4x384xbf16>,
    %c0_72 = arith.constant 0 : index
    %c0_73 = arith.constant 0 : index
    %c1 = arith.constant 1 : index
    %101 = vector.load %arg5[%c0_72, %c0_73, %c1] : memref<1x4x512xbf16, #tpu.memory_space<vmem>>, vector<1x4x384xbf16>
    %102 = vector.shape_cast %101 : vector<1x4x384xbf16> to vector<4x384xbf16>
    %c4 = arith.constant 4 : index
    %c0_74 = arith.constant 0 : index
    %103 = vector.load %arg6[%c4, %c0_74] : memref<36x384xbf16, #tpu.memory_space<vmem>>, vector<4x384xbf16>
    tpu.vector_store %arg6[%c4, %c0_74], %102 {strides = array<i32>} : memref<36x384xbf16, #tpu.memory_space<vmem>>, vector<4x384xbf16>,
    %c0_75 = arith.constant 0 : index
    %c0_76 = arith.constant 0 : index
    %c2 = arith.constant 2 : index
    %104 = vector.load %arg5[%c0_75, %c0_76, %c2] : memref<1x4x512xbf16, #tpu.memory_space<vmem>>, vector<1x4x384xbf16>
    %105 = vector.shape_cast %104 : vector<1x4x384xbf16> to vector<4x384xbf16>
    %c8 = arith.constant 8 : index
    %c0_77 = arith.constant 0 : index
    %106 = vector.load %arg6[%c8, %c0_77] : memref<36x384xbf16, #tpu.memory_space<vmem>>, vector<4x384xbf16>
    tpu.vector_store %arg6[%c8, %c0_77], %105 {strides = array<i32>} : memref<36x384xbf16, #tpu.memory_space<vmem>>, vector<4x384xbf16>,
    %c0_78 = arith.constant 0 : index
    %c0_79 = arith.constant 0 : index
    %c18 = arith.constant 18 : index
    %107 = vector.load %arg5[%c0_78, %c0_79, %c18] : memref<1x4x512xbf16, #tpu.memory_space<vmem>>, vector<1x4x384xbf16>
    %108 = vector.shape_cast %107 : vector<1x4x384xbf16> to vector<4x384xbf16>
    %c12 = arith.constant 12 : index
    %c0_80 = arith.constant 0 : index
    %109 = vector.load %arg6[%c12, %c0_80] : memref<36x384xbf16, #tpu.memory_space<vmem>>, vector<4x384xbf16>
    tpu.vector_store %arg6[%c12, %c0_80], %108 {strides = array<i32>} : memref<36x384xbf16, #tpu.memory_space<vmem>>, vector<4x384xbf16>,
    %c0_81 = arith.constant 0 : index
    %c0_82 = arith.constant 0 : index
    %c19_83 = arith.constant 19 : index
    %110 = vector.load %arg5[%c0_81, %c0_82, %c19_83] : memref<1x4x512xbf16, #tpu.memory_space<vmem>>, vector<1x4x384xbf16>
    %111 = vector.shape_cast %110 : vector<1x4x384xbf16> to vector<4x384xbf16>
    %c16_84 = arith.constant 16 : index
    %c0_85 = arith.constant 0 : index
    %112 = vector.load %arg6[%c16_84, %c0_85] : memref<36x384xbf16, #tpu.memory_space<vmem>>, vector<4x384xbf16>
    tpu.vector_store %arg6[%c16_84, %c0_85], %111 {strides = array<i32>} : memref<36x384xbf16, #tpu.memory_space<vmem>>, vector<4x384xbf16>,
    %c0_86 = arith.constant 0 : index
    %c0_87 = arith.constant 0 : index
    %c20 = arith.constant 20 : index
    %113 = vector.load %arg5[%c0_86, %c0_87, %c20] : memref<1x4x512xbf16, #tpu.memory_space<vmem>>, vector<1x4x384xbf16>
    %114 = vector.shape_cast %113 : vector<1x4x384xbf16> to vector<4x384xbf16>
    %c20_88 = arith.constant 20 : index
    %c0_89 = arith.constant 0 : index
    %115 = vector.load %arg6[%c20_88, %c0_89] : memref<36x384xbf16, #tpu.memory_space<vmem>>, vector<4x384xbf16>
    tpu.vector_store %arg6[%c20_88, %c0_89], %114 {strides = array<i32>} : memref<36x384xbf16, #tpu.memory_space<vmem>>, vector<4x384xbf16>,
    %c0_90 = arith.constant 0 : index
    %c0_91 = arith.constant 0 : index
    %c36 = arith.constant 36 : index
    %116 = vector.load %arg5[%c0_90, %c0_91, %c36] : memref<1x4x512xbf16, #tpu.memory_space<vmem>>, vector<1x4x384xbf16>
    %117 = vector.shape_cast %116 : vector<1x4x384xbf16> to vector<4x384xbf16>
    %c24 = arith.constant 24 : index
    %c0_92 = arith.constant 0 : index
    %118 = vector.load %arg6[%c24, %c0_92] : memref<36x384xbf16, #tpu.memory_space<vmem>>, vector<4x384xbf16>
    tpu.vector_store %arg6[%c24, %c0_92], %117 {strides = array<i32>} : memref<36x384xbf16, #tpu.memory_space<vmem>>, vector<4x384xbf16>,
    %c0_93 = arith.constant 0 : index
    %c0_94 = arith.constant 0 : index
    %c37_95 = arith.constant 37 : index
    %119 = vector.load %arg5[%c0_93, %c0_94, %c37_95] : memref<1x4x512xbf16, #tpu.memory_space<vmem>>, vector<1x4x384xbf16>
    %120 = vector.shape_cast %119 : vector<1x4x384xbf16> to vector<4x384xbf16>
    %c28 = arith.constant 28 : index
    %c0_96 = arith.constant 0 : index
    %121 = vector.load %arg6[%c28, %c0_96] : memref<36x384xbf16, #tpu.memory_space<vmem>>, vector<4x384xbf16>
    tpu.vector_store %arg6[%c28, %c0_96], %120 {strides = array<i32>} : memref<36x384xbf16, #tpu.memory_space<vmem>>, vector<4x384xbf16>,
    %c0_97 = arith.constant 0 : index
    %c0_98 = arith.constant 0 : index
    %c38 = arith.constant 38 : index
    %122 = vector.load %arg5[%c0_97, %c0_98, %c38] : memref<1x4x512xbf16, #tpu.memory_space<vmem>>, vector<1x4x384xbf16>
    %123 = vector.shape_cast %122 : vector<1x4x384xbf16> to vector<4x384xbf16>
    %c32_99 = arith.constant 32 : index
    %c0_100 = arith.constant 0 : index
    %124 = vector.load %arg6[%c32_99, %c0_100] : memref<36x384xbf16, #tpu.memory_space<vmem>>, vector<4x384xbf16>
    tpu.vector_store %arg6[%c32_99, %c0_100], %123 {strides = array<i32>} : memref<36x384xbf16, #tpu.memory_space<vmem>>, vector<4x384xbf16>,
    %c0_101 = arith.constant 0 : index
    %c0_102 = arith.constant 0 : index
    %125 = vector.load %arg2[%c0_101, %c0_102] : memref<8x36xbf16, #tpu.memory_space<vmem>>, vector<8x36xbf16>
    %c0_103 = arith.constant 0 : index
    %c0_104 = arith.constant 0 : index
    %126 = vector.load %arg6[%c0_103, %c0_104] : memref<36x384xbf16, #tpu.memory_space<vmem>>, vector<36x384xbf16>
    %cst_105 = arith.constant dense<0.000000e+00> : vector<8x384xf32>
    %127 = tpu.matmul %125, %126, %cst_105 {dimension_numbers = #tpu.dot_dimension_numbers<[1], [0], [0], [1], [0, 0, 1, 1], [], []>} : vector<8x36xbf16>, vector<36x384xbf16>, vector<8x384xf32> -> vector<8x384xf32>
    %c0_106 = arith.constant 0 : index
    %c0_107 = arith.constant 0 : index
    %128 = vector.load %arg3[%c0_106, %c0_107] : memref<8x1xf32, #tpu.memory_space<vmem>>, vector<8x1xf32>
    %129 = vector.broadcast %128 : vector<8x1xf32> to vector<8x384xf32>
    %130 = arith.addf %127, %129 : vector<8x384xf32>
    %cst_108 = arith.constant 0.000000e+00 : f32
    %131 = vector.broadcast %cst_108 : f32 to vector<8x384xf32>
    %132 = arith.maximumf %130, %131 : vector<8x384xf32>
    %c0_109 = arith.constant 0 : index
    %c0_110 = arith.constant 0 : index
    %c0_111 = arith.constant 0 : index
    %133 = vector.load %arg4[%c0_109, %c0_110, %c0_111] : memref<1x8x384xf32, #tpu.memory_space<vmem>>, vector<1x8x384xf32>
    %134 = vector.shape_cast %133 : vector<1x8x384xf32> to vector<8x384xf32>
    %135 = vector.shape_cast %132 : vector<8x384xf32> to vector<1x8x384xf32>
    tpu.vector_store %arg4[%c0_109, %c0_110, %c0_111], %135 {strides = array<i32>} : memref<1x8x384xf32, #tpu.memory_space<vmem>>, vector<1x8x384xf32>,
    return
  }
  func.func @transform_0(%arg0: i32) -> (i32, i32, i32) {
    %c0_i32 = arith.constant 0 : i32
    %c0_i32_0 = arith.constant 0 : i32
    %c0_i32_1 = arith.constant 0 : i32
    return %arg0, %c0_i32, %c0_i32_0 : i32, i32, i32
  }
  func.func @transform_1(%arg0: i32) -> (i32, i32) {
    %c0_i32 = arith.constant 0 : i32
    %c0_i32_0 = arith.constant 0 : i32
    %c0_i32_1 = arith.constant 0 : i32
    return %c0_i32, %c0_i32_0 : i32, i32
  }
  func.func @transform_2(%arg0: i32) -> (i32, i32) {
    %c0_i32 = arith.constant 0 : i32
    %c0_i32_0 = arith.constant 0 : i32
    %c0_i32_1 = arith.constant 0 : i32
    return %c0_i32, %c0_i32_0 : i32, i32
  }
  func.func @transform_3(%arg0: i32) -> (i32, i32, i32) {
    %c0_i32 = arith.constant 0 : i32
    %c0_i32_0 = arith.constant 0 : i32
    %c0_i32_1 = arith.constant 0 : i32
    return %arg0, %c0_i32, %c0_i32_0 : i32, i32, i32
  }
}

</mosaic_0001>

<bundles_post_ra>
// kernel: tpu_custom_call.1
= control target key start
LH: loop header
LB: loop body
LE: loop exit
PB: predicated region body
PF: predicated region fallthrough
CT: control target
= control target key end

     0   :  { %8 = vsyncpa [#allocation5], 0  ;;  %s1459_s0 = inlined_call_operand.hbm [shape: f32[2,4,256], index: 0, kind: input, shape index: {}]   ;;  %s1460_s1 = inlined_call_operand.vmem [shape: bf16[8,36], index: 1, kind: input, shape index: {}]   ;;  %s1461_s2 = inlined_call_operand.vmem [shape: f32[8,1], index: 2, kind: input, shape index: {}]   ;;  %s1462_s3 = inlined_call_operand.hbm [shape: f32[2,8,384], index: 3, kind: output, shape index: {}]  }
   0x1   :  { %10 = vsyncpa [#allocation5 + $0x1], 0 }
   0x2   :  { %11 = vsyncpa [#allocation6], 0 }
   0x3   :  { %13 = vsyncpa [#allocation6 + $0x1], 0  ;;  %s1230_s12 = smov 0   ;;  %s1232_s13 = smov 0  }
   0x4   :  { %s1234_s14 = smov 0   ;;  %s1236_s15 = smov 0  }
   0x5 LB: > { %s1251_s16 = sadd.s32 4294967295, %s1178_s15   ;;  %s952_s17 = sadd.s32 4294967294, %s1178_s15   ;;  %s1178_s15 = sphi %s1236_s15, %s1477_s15   ;;  %s1174_s14 = sphi %s1234_s14, %s1476_s14   ;;  %s1170_s13 = sphi %s1232_s13, %s1475_s13   ;;  %s1166_s12 = sphi %s1230_s12, %s1474_s12  }
   0x6   : > { %s1255_s18 = sadd.s32 1, %s1178_s15   ;;  %s26_s19 = sadd.s32 1, %s1174_s14 }
   0x7   : > { %s23_s20 = ssub.s32 %s1178_s15, %s1255_s18  ;;  %p33_p0 = scmp.ne.s32.totalorder %s1174_s14, %s1170_s13 }
   0x8   : > { %p24_p1 = scmp.eq.s32.totalorder %s23_s20, 0  ;;  %p34_p2 = scmp.eq.s32.totalorder %s1178_s15, 0 }
   0x9   : > { %p39_p3 = scmp.ne.s32.totalorder %s1170_s13, %s1166_s12  ;;  %p40_p4 = scmp.eq.s32.totalorder %s1251_s16, 0 }
   0xa   : > { %s1267_s21 = scalar_select %p24_p1, %s1174_s14, %s26_s19  }
   0xb   : > { %p1269_p5 = por %p34_p2, %p33_p0  ;;  %p1273_p6 = por %p40_p4, %p39_p3 }
   0xc   : > { %p105_p7 = scmp.eq.s32.totalorder %s1251_s16, 1  ;;  %p111_p8 = scmp.eq.s32.totalorder %s952_s17, 1 }
   0xd   : > { %p1006_p10 = scmp.lt.s32.totalorder %s1178_s15, 2  ;;  %s137_s26 = sand.u32 1, %s1174_s14  }
   0xe   : > { %p1280_p11 = por %p105_p7, %p33_p0  ;;  %p1284_p12 = por %p111_p8, %p39_p3 }
   0xf   : > { %s977_s27 = sshll.u32 %s1178_s15, 7  ;;  %s955_s28 = sshll.u32 %s137_s26, 3 }
  0x10   : > { %s1466_s24 = scalar_select %p1280_p11, 1, 0 }
  0x11   : > { %s1467_s25 = scalar_select %p1284_p12, 1, 0 }
  0x12   : > { %s1293_s4 = scalar_lea.hbm %s1459_s0, %s977_s27  ;;  %s141_s5 = scalar_lea.vmem [#allocation4], %s955_s28 }
  0x13   : > { %s149_s6 = sshll.u32 %s141_s5, 4  ;;  %p1297_p13 = pnand %p1006_p10, %p1269_p5  ;;  %s1301_s6 = int_to_ptr.vmem [resolvable:$true] %s149_s6 }
  0x14   : > { %s138_s8 = scalar_lea.sflag [#allocation5], %s137_s26  ;;  %s1082_s9 = scalar_lea.hbm %s1293_s4, 128 }
  0x15   : > { %p1083_p2 = scmp.ne.s32.totalorder %s1293_s4, %s1082_s9  ;;  %p1084_p3 = pneg %p1297_p13 }
  0x16   : > { %s1087_s17 = scalar_lea.hbm %s1459_s0, 256  ;;  %p1088_p5 = scmp.lt.u32.totalorder %s1293_s4, %s1459_s0 }
  0x17   : > { %p1085_p4 = pnand %p1084_p3, %p1083_p2  ;;  %p1089_p8 = scmp.lt.u32.totalorder %s1087_s17, %s1082_s9 }
  0x18   : > { %p1091_p9 = scmp.lt.u32.totalorder %s1082_s9, %s1293_s4 }
  0x19   : > { %p1086_p7 = pneg %p1085_p4  ;;  %p1090_p10 = por %p1089_p8, %p1088_p5 }
  0x1b   : > { %p1092_p0 = por %p1091_p9, %p1090_p10 }
  0x1d   : > { %p1093_p1 = pnand %p1092_p0, %p1086_p7 }
  0x1f   : > { %1096 = shalt.err (!%p1093_p1)
}
  0x20   : > { %s1097_s22 = scalar_lea.vmem %s1301_s6, 128  ;;  %s1180_s26 = smov [#allocation4]  }
  0x21   : > { %p1098_p2 = scmp.ne.s32.totalorder %s1301_s6, %s1097_s22  ;;  %s1102_s27 = sshll.u32 %s1180_s26, 4  ;;  %s1103_s27 = int_to_ptr.vmem [resolvable:$false] %s1102_s27 }
  0x22   : > { %s1104_s28 = scalar_lea.vmem %s1103_s27, 256  ;;  %p1105_p11 = scmp.lt.s32.totalorder %s1301_s6, %s1103_s27 }
  0x23   : > { %p1100_p4 = pnand %p1098_p2, %p1084_p3  ;;  %p1106_p5 = scmp.lt.s32.totalorder %s1104_s28, %s1097_s22 }
  0x25   : > { %p1101_p12 = pneg %p1100_p4  ;;  %p1107_p8 = por %p1106_p5, %p1105_p11 }
  0x27   : > { %p1108_p9 = pnand %p1107_p8, %p1101_p12 }
  0x29   : > { %1111 = shalt.err (!%p1108_p9)
}
  0x2a   : > { %1001 = dma.hbm_to_vmem [thread:$0]  (!%p1297_p13), %s1293_s4, 128, %s1301_s6, %s138_s8  }
  0x2b   : > { %p1469_p0 = scmp.lt.s32.totalorder %s1178_s15, 3  ;;  %p1470_p1 = scmp.ge.s32.totalorder %s1178_s15, 1 }
  0x2d   : > { %p155_p3 = pnand %p1470_p1, %p1469_p0 }
  0x2e   : > { %s1335_s29 = sand.u32 (!%p155_p3), 1, %s1170_s13  }
  0x2f   : > { %158 = sbr.rel (%p155_p3) target bundleno = 611 (0x263), region = 32  ;;  %s959_s30 = sshll.u32 (!%p155_p3), %s1335_s29, 3 }
  0x30   : > { %s161_s5 = scalar_lea.sflag (!%p155_p3), [#allocation5], %s1335_s29  ;;  %s1339_s9 = scalar_lea.vmem (!%p155_p3), [#allocation4], %s959_s30 }
  0x36   : > { %1157 = dma.done.wait (%p1273_p6), %s161_s5, 128  }
  0x37   : > { %1159 = vsyncadd (%p1273_p6), %s161_s5, 4294967168  ;;  %v195_v0 = vlaneseq  ;;  %v1181_v1 = vmov 1983009808   ;;  %v1182_v3 = vmov 0   ;;  %v219_v7 = vld [vmem:[%s1339_s9] sm:$0xf] }
  0x38   : > { %v193_v2 = vunpack.c.l.s4 %v1181_v1  ;;  %188 = vst [vmem:[#allocation2] sm:$0xff] %v1182_v3  ;;  %812 = vmatprep.mubr.bf16.mxu0 %v1182_v3  ;;  %1068 = vset.pattern.permute.xlu0 %v1182_v3  ;;  %v189_v8 = vld [vmem:[%s1339_s9] sm:$0xf]  ;;  %v220_v10 = vpack.c.bf16 %v219_v7, %v219_v7  ;;  %s1183_s23 = smov 23   ;;  %s1184_s4 = smov 19   ;;  %vm202_vm0 = vcmask 279704  }
  0x39   : > { %v196_v4 = vshrl.u32 %v195_v0, 7  ;;  %v234_v9 = vld [vmem:[%s1339_s9] sm:$0xf]  ;;  %v190_v11 = vpack.c.bf16 %v189_v8, %v189_v8  ;;  %s1185_s6 = smov 25   ;;  %s1186_s7 = smov 21   ;;  %vm217_vm1 = vcmask 427304  }
  0x3a   : > { %v194_v5 = vunpack.c.0.s8 %v193_v2  ;;  %v235_v12 = vpack.c.bf16 %v234_v9, %v234_v9  ;;  %v204_v13 = vld [vmem:[%s1339_s9] sm:$0xf]  ;;  %v329_v29 = vld [vmem:[%s1339_s9 + $0x4] sm:$0xf]  ;;  %s1187_s8 = smov 27   ;;  %s1188_s10 = smov 31  }
  0x3b   : > { %v249_v14 = vld [vmem:[%s1339_s9] sm:$0xf]  ;;  %v205_v15 = vpack.c.bf16 %v204_v13, %v204_v13  ;;  %v314_v30 = vld [vmem:[%s1339_s9 + $0x4] sm:$0xf]  ;;  %v330_v33 = vpack.c.bf16 %v329_v29, %v329_v29  ;;  %s1189_s11 = smov 33   ;;  %s1190_s17 = smov 29  }
  0x3c   : > { %v1345_v6 = vsub.s32 %v194_v5, %v196_v4  ;;  %v279_v16 = vld [vmem:[%s1339_s9] sm:$0xf]  ;;  %v250_v19 = vpack.c.bf16 %v249_v14, %v249_v14  ;;  %v315_v34 = vpack.c.bf16 %v314_v30, %v314_v30  ;;  %v389_v35 = vld [vmem:[%s1339_s9 + $0x4] sm:$0xf]  ;;  %s1191_s19 = smov 37   ;;  %s1192_s20 = smov 35  }
  0x3d   : > { %v280_v22 = vpack.c.bf16 %v279_v16, %v279_v16  ;;  %v299_v23 = vld [vmem:[%s1339_s9] sm:$0xf]  ;;  %v344_v36 = vld [vmem:[%s1339_s9 + $0x4] sm:$0xf]  ;;  %v390_v37 = vpack.c.bf16 %v389_v35, %v389_v35  ;;  %s1193_s22 = smov 45   ;;  %s1194_s26 = smov 39  }
  0x3e   : > { %v228_v17 = vrot.slane %v220_v10, %v1345_v6  ;;  %v198_v18 = vrot.slane %v190_v11, %v1345_v6  ;;  %v243_v20 = vrot.slane %v235_v12, %v1345_v6  ;;  %v213_v21 = vrot.slane %v205_v15, %v1345_v6  ;;  %v264_v24 = vld [vmem:[%s1339_s9] sm:$0xf]  ;;  %v359_v41 = vld [vmem:[%s1339_s9 + $0x4] sm:$0xf]  ;;  %s1195_s27 = smov 41   ;;  %s1196_s28 = smov 43  }
  0x3f   : > { %v300_v25 = vpack.c.bf16 %v299_v23, %v299_v23  ;;  %v258_v26 = vrot.slane %v250_v19, %v1345_v6  ;;  %v288_v27 = vrot.slane %v280_v22, %v1345_v6  ;;  %v265_v28 = vpack.c.bf16 %v264_v24, %v264_v24  ;;  %v374_v42 = vld [vmem:[%s1339_s9 + $0x4] sm:$0xf]  ;;  %s1197_s30 = smov 47   ;;  %s1198_s5 = smov 49  }
  0x40   : > { %229 = vrot.lane.b32.xlu1 %v228_v17, %s1183_s23  ;;  %199 = vrot.lane.b32.xlu0 %v198_v18, %s1184_s4  ;;  %v338_v38 = vrot.slane %v330_v33, %v1345_v6  ;;  %v323_v39 = vrot.slane %v315_v34, %v1345_v6  ;;  %v345_v40 = vpack.c.bf16 %v344_v36, %v344_v36  ;;  %v409_v47 = vld [vmem:[%s1339_s9 + $0x4] sm:$0xf]  ;;  %vm232_vm2 = vcmask 574904   ;;  %s1200_s23 = smov 127   ;;  %s1201_s4 = smov 109  }
  0x41   : > { %v308_v31 = vrot.slane %v300_v25, %v1345_v6  ;;  %v273_v32 = vrot.slane %v265_v28, %v1345_v6  ;;  %v360_v43 = vpack.c.bf16 %v359_v41, %v359_v41  ;;  %v398_v44 = vrot.slane %v390_v37, %v1345_v6  ;;  %v424_v48 = vld [vmem:[%s1339_s9 + $0x4] sm:$0xf]  ;;  %s1199_s9 = smov 126   ;;  %p1471_p11 = scmp.ne.s32.totalorder %s1466_s24, 0 }
  0x42   : > { %v353_v45 = vrot.slane %v345_v40, %v1345_v6  ;;  %v375_v46 = vpack.c.bf16 %v374_v42, %v374_v42  ;;  %v410_v49 = vpack.c.bf16 %v409_v47, %v409_v47  ;;  %v425_v52 = vpack.c.bf16 %v424_v48, %v424_v48 }
  0x43   : > { %v368_v50 = vrot.slane %v360_v43, %v1345_v6  ;;  %vm247_vm3 = vcmask 722504   ;;  %vm262_vm4 = vcmask 870104   ;;  %vm295_vm5 = vcmask 1042424  }
  0x44   : > { %244 = vrot.lane.b32.xlu1 %v243_v20, %s1185_s6  ;;  %214 = vrot.lane.b32.xlu0 %v213_v21, %s1186_s7  ;;  %v383_v51 = vrot.slane %v375_v46, %v1345_v6  ;;  %v418_v53 = vrot.slane %v410_v49, %v1345_v6  ;;  %v433_v54 = vrot.slane %v425_v52, %v1345_v6  ;;  %vm296_vm6 = vcmask 117762   ;;  %s1202_s6 = smov 110   ;;  %s1203_s7 = smov 92   ;;  %v720_v21 = vld [vmem:[%s1461_s2] sm:$0xff] }
  0x45   : > { %vm292_vm7 = vcmask 252928   ;;  %vm277_vm8 = vcmask 1017704   ;;  %vm297_vm9 = vmor %vm296_vm6, %vm295_vm5  ;;  %vm312_vm10 = vcmask 263304   ;;  %vm327_vm11 = vcmask 410904  }
  0x46   : > { %vm342_vm12 = vcmask 558504   ;;  %vm357_vm13 = vcmask 706104   ;;  %vm405_vm14 = vcmask 1042408   ;;  %vm406_vm15 = vcmask 101378  }
  0x47   : > { %vm437_vm5 = vcmask 394504   ;;  %v1206_v20 = vmov 0.0   ;;  %vm1208_vm6 = vmmov 0  }
  0x48   : > { %259 = vrot.lane.b32.xlu1 %v258_v26, %s1187_s8  ;;  %289 = vrot.lane.b32.xlu0 %v288_v27, %s1188_s10  ;;  %s1204_s8 = smov 108   ;;  %s1205_s10 = smov 91  }
  0x49   : > { %982 = vmatprep.subr.bf16.mxu1 %v1206_v20  ;;  %988 = vmatprep.mubr.msk.bf16.mxu1 %vm1208_vm6, %v1206_v20 }
  0x4c   : > { %309 = vrot.lane.b32.xlu1 %v308_v31, %s1189_s11  ;;  %274 = vrot.lane.b32.xlu0 %v273_v32, %s1190_s17  ;;  %s1207_s11 = smov 90  }
  0x50   : > { %339 = vrot.lane.b32.xlu1 %v338_v38, %s1191_s19  ;;  %324 = vrot.lane.b32.xlu0 %v323_v39, %s1192_s20 }
  0x54   : > { %399 = vrot.lane.b32.xlu1 %v398_v44, %s1193_s22  ;;  %354 = vrot.lane.b32.xlu0 %v353_v45, %s1194_s26  ;;  %s992_s26 = smul.u32 24, %s1335_s29 }
  0x58   : > { %369 = vrot.lane.b32.xlu0 %v368_v50, %s1195_s27  ;;  %384 = vrot.lane.b32.xlu1 %v383_v51, %s1196_s28  ;;  %s993_s27 = smul.u32 384, %s1251_s16  ;;  %s186_s28 = scalar_lea.vmem [#allocation7], %s992_s26 }
  0x59   : > { %s868_s16 = scalar_lea.sflag [#allocation6], %s1335_s29 }
  0x5c   : > { %419 = vrot.lane.b32.xlu0 %v418_v53, %s1197_s30  ;;  %434 = vrot.lane.b32.xlu1 %v433_v54, %s1198_s5  ;;  %s882_s30 = sshll.u32 %s186_s28, 4  ;;  %s1417_s30 = int_to_ptr.vmem [resolvable:$true] %s882_s30 }
  0xb2   : > { %v230_v55 = vpop.permute.xlu1 %229  ;;  %v200_v56 = vpop.permute.xlu0 %199 }
  0xb3   : > { %203 = vst.msk [vmem:[#allocation2] sm:$0x3] %vm202_vm0, %v200_v56  ;;  %vm372_vm0 = vcmask 853704  }
  0xb6   : > { %v245_v57 = vpop.permute.xlu1 %244  ;;  %v215_v58 = vpop.permute.xlu0 %214 }
  0xb7   : > { %218 = vst.msk [vmem:[#allocation2] sm:$0x3] %vm217_vm1, %v215_v58  ;;  %vm402_vm1 = vcmask 367616  }
  0xb8   : > { %233 = vst.msk [vmem:[#allocation2] sm:$0x3] %vm232_vm2, %v230_v55  ;;  %vm387_vm2 = vcmask 1001304  }
  0xb9   : > { %248 = vst.msk [vmem:[#allocation2] sm:$0x3] %vm247_vm3, %v245_v57  ;;  %vm407_vm3 = vmor %vm406_vm15, %vm405_vm14  ;;  %vm640_vm14 = vcmask 752640   ;;  %vm702_vm15 = vcmask 736256  }
  0xba   : > { %v260_v59 = vpop.permute.xlu1 %259  ;;  %v290_v60 = vpop.permute.xlu0 %289 }
  0xbb   : > { %263 = vst.msk [vmem:[#allocation2] sm:$0x3] %vm262_vm4, %v260_v59  ;;  %v291_v61 = vrot.slane %v290_v60, 6  ;;  %vm422_vm4 = vcmask 246904  }
  0xbd   : > { %v293_v0 = vsel %vm292_vm7, %v291_v61, %v290_v60  ;;  %vm485_vm7 = vcmask 1039360  }
  0xbe   : > { %v310_v62 = vpop.permute.xlu1 %309  ;;  %v275_v63 = vpop.permute.xlu0 %274 }
  0xbf   : > { %278 = vst.msk [vmem:[#allocation2] sm:$0x3] %vm277_vm8, %v275_v63  ;;  %vm547_vm8 = vcmask 900096  }
  0xc0   : > { %298 = vst.msk [vmem:[#allocation2] sm:$0xf] %vm297_vm9, %v293_v0  ;;  %vm609_vm9 = vcmask 883712  }
  0xc1   : > { %313 = vst.msk [vmem:[#allocation2 + $0x2] sm:$0x3] %vm312_vm10, %v310_v62  ;;  %vm671_vm10 = vcmask 744448  }
  0xc2   : > { %v340_v1 = vpop.permute.xlu1 %339  ;;  %v325_v2 = vpop.permute.xlu0 %324 }
  0xc3   : > { %328 = vst.msk [vmem:[#allocation2 + $0x2] sm:$0x3] %vm327_vm11, %v325_v2  ;;  %vm483_vm11 = vcmask 1043456  }
  0xc4   : > { %343 = vst.msk [vmem:[#allocation2 + $0x2] sm:$0x3] %vm342_vm12, %v340_v1  ;;  %vm516_vm12 = vcmask 1031168  }
  0xc6   : > { %v400_v3 = vpop.permute.xlu1 %399  ;;  %v355_v4 = vpop.permute.xlu0 %354 }
  0xc7   : > { %358 = vst.msk [vmem:[#allocation2 + $0x2] sm:$0x3] %vm357_vm13, %v355_v4  ;;  %v401_v5 = vrot.slane %v400_v3, 6  ;;  %vm578_vm13 = vcmask 891904  }
  0xc9   : > { %v403_v9 = vsel %vm402_vm1, %v401_v5, %v400_v3  ;;  %vm766_vm1 = vcmask 293888  }
  0xca   : > { %v370_v7 = vpop.permute.xlu0 %369  ;;  %v385_v8 = vpop.permute.xlu1 %384 }
  0xcb   : > { %373 = vst.msk [vmem:[#allocation2 + $0x2] sm:$0x3] %vm372_vm0, %v370_v7  ;;  %vm770_vm0 = vcmask 1041408  }
  0xcc   : > { %388 = vst.msk [vmem:[#allocation2 + $0x2] sm:$0x3] %vm387_vm2, %v385_v8 }
  0xcd   : > { %408 = vst.msk [vmem:[#allocation2 + $0x2] sm:$0xf] %vm407_vm3, %v403_v9 }
  0xce   : > { %v420_v10 = vpop.permute.xlu0 %419  ;;  %v435_v11 = vpop.permute.xlu1 %434 }
  0xcf   : > { %423 = vst.msk [vmem:[#allocation2 + $0x4] sm:$0x3] %vm422_vm4, %v420_v10 }
  0xd0   : > { %438 = vst.msk [vmem:[#allocation2 + $0x4] sm:$0x3] %vm437_vm5, %v435_v11 }
  0xd7   : > { %v439_v12 = vld [vmem:[#allocation2] sm:$0x3f] }
  0xd8   : > { %v492_v13 = vld [vmem:[#allocation2] sm:$0xff]  ;;  %960 = vst.sshfl [vmem:[#allocation3] sm:$0xf pattern:$0x76325410] %v439_v12  ;;  %v441_v15 = vcombine.high %v439_v12, %v439_v12 }
  0xd9   : > { %v501_v14 = vrot.slane %v492_v13, %v1345_v6  ;;  %v462_v16 = vcombine.low %v492_v13, %v492_v13  ;;  %v494_v18 = vcombine.high %v492_v13, %v492_v13 }
  0xda   : > { %961 = vst.sshfl [vmem:[#allocation3 + $0x8] sm:$0x3 pattern:$0x76325410] %v441_v15 }
  0xdb   : > { %509 = vrot.lane.b32.xlu0 %v501_v14, %s1199_s9  ;;  %479 = vrot.lane.b32.xlu1 %v501_v14, %s1200_s23  ;;  %v469_v17 = vrot.slane %v462_v16, %v1345_v6  ;;  %v508_v19 = vrot.slane %v494_v18, %v1345_v6 }
  0xdf   : > { %571 = vrot.lane.b32.xlu0 %v501_v14, %s1201_s4  ;;  %542 = vrot.lane.b32.xlu1 %v501_v14, %s1202_s6 }
  0xe3   : > { %633 = vrot.lane.b32.xlu0 %v501_v14, %s1203_s7  ;;  %604 = vrot.lane.b32.xlu1 %v501_v14, %s1204_s8 }
  0xe7   : > { %666 = vrot.lane.b32.xlu1 %v501_v14, %s1205_s10  ;;  %477 = vrot.lane.b32.xlu0 %v469_v17, %s1200_s23  ;;  %s1415_s23 = scalar_lea.hbm %s1462_s3, %s993_s27 }
  0xeb   : > { %511 = vrot.lane.b32.xlu1 %v508_v19, %s1199_s9  ;;  %540 = vrot.lane.b32.xlu0 %v469_v17, %s1202_s6  ;;  %s1209_s6 = smov [#allocation7]  }
  0xef   : > { %573 = vrot.lane.b32.xlu1 %v508_v19, %s1201_s4  ;;  %602 = vrot.lane.b32.xlu0 %v469_v17, %s1204_s8  ;;  %s1112_s4 = scalar_lea.vmem %s1417_s30, 384 }
  0xf0   : > { %p1113_p6 = scmp.ne.s32.totalorder %s1417_s30, %s1112_s4 }
  0xf2   : > { %p1114_p12 = pnand %p1113_p6, %p1471_p11 }
  0xf3   : > { %635 = vrot.lane.b32.xlu1 %v508_v19, %s1203_s7  ;;  %664 = vrot.lane.b32.xlu0 %v469_v17, %s1205_s10  ;;  %s1116_s7 = sshll.u32 %s1209_s6, 4  ;;  %s1117_s7 = int_to_ptr.vmem [resolvable:$false] %s1116_s7 }
  0xf4   : > { %p1115_p13 = pneg %p1114_p12  ;;  %s1118_s8 = scalar_lea.vmem %s1117_s7, 768 }
  0xf5   : > { %p1119_p7 = scmp.lt.s32.totalorder %s1417_s30, %s1117_s7  ;;  %p1120_p10 = scmp.lt.s32.totalorder %s1118_s8, %s1112_s4 }
  0xf7   : > { %697 = vrot.lane.b32.xlu1 %v508_v19, %s1207_s11  ;;  %695 = vrot.lane.b32.xlu0 %v501_v14, %s1207_s11  ;;  %p1121_p2 = por %p1120_p10, %p1119_p7 }
  0xf9   : > { %p1122_p4 = pnand %p1121_p2, %p1115_p13 }
  0xfb   : > { %723 = vperm.xlu0 %1068, %v720_v21  }
 0x14d   : > { %v510_v6 = vpop.permute.xlu0 %509  ;;  %v480_v22 = vpop.permute.xlu1 %479 }
 0x14e   : > { %v482_v23 = vrot.slane %v480_v22, 4  ;;  %v513_v42 = vrot.slane %v510_v6, 4 }
 0x150   : > { %v487_v24 = vsel %vm485_vm7, %v480_v22, %v482_v23 }
 0x151   : > { %491 = vst [vmem:[#allocation3 + $0x8] sm:$0xc] %v487_v24  ;;  %v572_v25 = vpop.permute.xlu0 %571  ;;  %v543_v26 = vpop.permute.xlu1 %542 }
 0x152   : > { %v545_v27 = vrot.slane %v543_v26, 4  ;;  %v575_v52 = vrot.slane %v572_v25, 4 }
 0x154   : > { %v549_v28 = vsel %vm547_vm8, %v543_v26, %v545_v27 }
 0x155   : > { %553 = vst [vmem:[#allocation3 + $0x14] sm:$0xc] %v549_v28  ;;  %v634_v29 = vpop.permute.xlu0 %633  ;;  %v605_v30 = vpop.permute.xlu1 %604 }
 0x156   : > { %v607_v31 = vrot.slane %v605_v30, 4  ;;  %v637_v62 = vrot.slane %v634_v29, 4 }
 0x158   : > { %v611_v32 = vsel %vm609_vm9, %v605_v30, %v607_v31 }
 0x159   : > { %615 = vst [vmem:[#allocation3 + $0x20] sm:$0xc] %v611_v32  ;;  %v667_v33 = vpop.permute.xlu1 %666  ;;  %v478_v34 = vpop.permute.xlu0 %477 }
 0x15a   : > { %v669_v35 = vrot.slane %v667_v33, 4  ;;  %v481_v36 = vrot.slane %v478_v34, 4 }
 0x15c   : > { %v673_v37 = vsel %vm671_vm10, %v667_v33, %v669_v35  ;;  %v484_v38 = vsel %vm483_vm11, %v481_v36, %v482_v23 }
 0x15d   : > { %677 = vst [vmem:[#allocation3 + $0x2c] sm:$0xc] %v673_v37  ;;  %v486_v39 = vsel %vm485_vm7, %v478_v34, %v484_v38  ;;  %v512_v40 = vpop.permute.xlu1 %511  ;;  %v541_v41 = vpop.permute.xlu0 %540 }
 0x15e   : > { %490 = vst [vmem:[#allocation3] sm:$0xcc] %v486_v39  ;;  %v514_v43 = vrot.slane %v512_v40, 4  ;;  %v544_v44 = vrot.slane %v541_v41, 4 }
 0x160   : > { %v515_v45 = vsel %vm483_vm11, %v513_v42, %v514_v43  ;;  %v518_v46 = vsel %vm516_vm12, %v512_v40, %v514_v43  ;;  %v546_v47 = vsel %vm483_vm11, %v544_v44, %v545_v27 }
 0x161   : > { %v517_v48 = vsel %vm516_vm12, %v510_v6, %v515_v45  ;;  %522 = vst [vmem:[#allocation3 + $0x14] sm:$0x3] %v518_v46  ;;  %v548_v49 = vsel %vm547_vm8, %v541_v41, %v546_v47  ;;  %v574_v50 = vpop.permute.xlu1 %573  ;;  %v603_v51 = vpop.permute.xlu0 %602 }
 0x162   : > { %521 = vst [vmem:[#allocation3 + $0xc] sm:$0x33] %v517_v48  ;;  %552 = vst [vmem:[#allocation3 + $0xc] sm:$0xcc] %v548_v49  ;;  %v576_v53 = vrot.slane %v574_v50, 4  ;;  %v606_v54 = vrot.slane %v603_v51, 4 }
 0x164   : > { %v577_v55 = vsel %vm483_vm11, %v575_v52, %v576_v53  ;;  %v580_v56 = vsel %vm578_vm13, %v574_v50, %v576_v53  ;;  %v608_v57 = vsel %vm483_vm11, %v606_v54, %v607_v31 }
 0x165   : > { %v579_v58 = vsel %vm578_vm13, %v572_v25, %v577_v55  ;;  %584 = vst [vmem:[#allocation3 + $0x20] sm:$0x3] %v580_v56  ;;  %v610_v59 = vsel %vm609_vm9, %v603_v51, %v608_v57  ;;  %v636_v60 = vpop.permute.xlu1 %635  ;;  %v665_v61 = vpop.permute.xlu0 %664  ;;  %v709_v25 = vld [vmem:[%s1460_s1] sm:$0xf] }
 0x166   : > { %583 = vst [vmem:[#allocation3 + $0x18] sm:$0x33] %v579_v58  ;;  %614 = vst [vmem:[#allocation3 + $0x18] sm:$0xcc] %v610_v59  ;;  %v638_v63 = vrot.slane %v636_v60, 4  ;;  %v668_v0 = vrot.slane %v665_v61, 4 }
 0x168   : > { %v639_v1 = vsel %vm483_vm11, %v637_v62, %v638_v63  ;;  %v642_v2 = vsel %vm640_vm14, %v636_v60, %v638_v63  ;;  %v670_v3 = vsel %vm483_vm11, %v668_v0, %v669_v35  ;;  %v1071_v4 = vld [vmem:[#allocation3 + $0x8] ss:$12 sps:$4 sm:$0xff]  }
 0x169   : > { %v641_v5 = vsel %vm640_vm14, %v634_v29, %v639_v1  ;;  %646 = vst [vmem:[#allocation3 + $0x2c] sm:$0x3] %v642_v2  ;;  %v672_v7 = vsel %vm671_vm10, %v665_v61, %v670_v3  ;;  %v698_v8 = vpop.permute.xlu1 %697  ;;  %v696_v9 = vpop.permute.xlu0 %695  ;;  %v1072_v10 = vld [vmem:[#allocation3 + $0x4] ss:$12 sps:$4 sm:$0xff]   ;;  %v1074_v11 = vld [vmem:[#allocation3] ss:$12 sps:$4 sm:$0xff]   ;;  %983 = vmatpush3.bf16.msra.mxu1 %v1071_v4 }
 0x16a   : > { %645 = vst [vmem:[#allocation3 + $0x24] sm:$0x33] %v641_v5  ;;  %676 = vst [vmem:[#allocation3 + $0x24] sm:$0xcc] %v672_v7  ;;  %v700_v12 = vrot.slane %v698_v8, 4  ;;  %v699_v13 = vrot.slane %v696_v9, 4  ;;  %780 = vmatprep.subr.bf16.mxu0 %v1072_v10  ;;  %984 = vmatprep.subr.bf16.mxu1 %v1206_v20 }
 0x16b   : > { %781 = vmatpush1.bf16.msra.mxu0 %v1074_v11 }
 0x16c   : > { %v704_v14 = vsel %vm702_vm15, %v698_v8, %v700_v12  ;;  %v701_v15 = vsel %vm483_vm11, %v699_v13, %v700_v12 }
 0x16d   : > { %708 = vst [vmem:[#allocation3 + $0x38] sm:$0x3] %v704_v14  ;;  %v703_v16 = vsel %vm702_vm15, %v696_v9, %v701_v15 }
 0x16e   : > { %707 = vst [vmem:[#allocation3 + $0x30] sm:$0x33] %v703_v16 }
 0x170   : > { %v1075_v17 = vld [vmem:[#allocation3 + $0x20] ss:$12 sps:$4 sm:$0xff]  }
 0x171   : > { %v1076_v18 = vld [vmem:[#allocation3 + $0x1c] ss:$12 sps:$4 sm:$0xff]   ;;  %v1078_v19 = vld [vmem:[#allocation3 + $0x18] ss:$12 sps:$4 sm:$0xff]   ;;  %985 = vmatpush3.bf16.msra.mxu1 %v1075_v17 }
 0x172   : > { %782 = vmatprep.subr.bf16.mxu0 %v1076_v18  ;;  %986 = vmatprep.subr.bf16.mxu1 %v1206_v20 }
 0x173   : > { %783 = vmatpush1.bf16.msra.mxu0 %v1078_v19 }
 0x174   : > { %v1080_v21 = vld [vmem:[#allocation3 + $0x38] ss:$0 sps:$4 sm:$0x33]  }
 0x175   : > { %v718_v6 = vld [vmem:[#allocation3 + $0x30] sm:$0x33]  ;;  %v778_v23 = vsel %vm770_vm0, %v1080_v21, 0 }
 0x176   : > { %v969_v22 = vcombine.high %v718_v6, %v718_v6  ;;  %v968_v24 = vcombine.low %v718_v6, %v718_v6  ;;  %987 = vmatpush3.bf16.msra.mxu1 %v778_v23 }
 0x178   : > { %971 = vmatprep.subr.msk.bf16.mxu0 %vm770_vm0, %v969_v22  ;;  %v772_v26 = vsel %vm770_vm0, %v968_v24, 0 }
 0x179   : > { %785 = vmatpush1.bf16.msra.mxu0 %v772_v26  ;;  %989 = vmatmul.mubr.msk.bf16.vlgmr.msra.gmra.mrb[0].mxu1 %vm766_vm1, %v709_v25 }
 0x17a   : > { %v724_v20 = vpop.permute.xlu0 %723 }
 0x17c   : > { %972 = vmatmul.mubr.msk.bf16.vlgmr.msra.gmra.mrb[0].mxu0 %vm766_vm1, %v709_v25 }
 0x24c   : > { %v855_v27 = vpop.f32.mrb[0].mxu1 }
 0x24d   : > { %v856_v28 = vadd.f32 %v855_v27, %v724_v20  ;;  %v990_v29 = vpop.f32.mrb[1].mxu1 }
 0x24e   : > { %v858_v31 = vpop.f32.mrb[2].mxu1 }
 0x24f   : > { %v814_v30 = vpop.f32.mrb[0].mxu0  ;;  %v863_v32 = vmax.f32 %v856_v28, 0.0  ;;  %v991_v35 = vpop.f32.mrb[3].mxu1 }
 0x250   : > { %v815_v33 = vadd.f32 %v814_v30, %v724_v20  ;;  %v816_v34 = vpop.f32.mrb[1].mxu0 }
 0x251   : > { %v817_v36 = vadd.f32 %v816_v34, %v724_v20  ;;  %v818_v37 = vpop.f32.mrb[2].mxu0  ;;  %866 = vst [vmem:[%s186_s28 + $0x10] sm:$0xff] %v863_v32 }
 0x252   : > { %v861_v38 = vmax.f32 %v815_v33, 0.0  ;;  %v819_v39 = vpop.f32.mrb[3].mxu0 }
 0x253   : > { %v862_v40 = vmax.f32 %v817_v36, 0.0 }
 0x254   : > { %864 = vst [vmem:[%s186_s28] sm:$0xff] %v861_v38 }
 0x255   : > { %865 = vst [vmem:[%s186_s28 + $0x8] sm:$0xff] %v862_v40 }
 0x256   : > { %1125 = shalt.err (!%p1122_p4)
}
 0x257   : > { %s1126_s29 = scalar_lea.hbm %s1415_s23, 384  ;;  %s1130_s17 = scalar_lea.hbm %s1462_s3, 768 }
 0x258   : > { %p1127_p5 = scmp.ne.s32.totalorder %s1415_s23, %s1126_s29  ;;  %p1131_p0 = scmp.lt.u32.totalorder %s1415_s23, %s1462_s3 }
 0x259   : > { %p1132_p1 = scmp.lt.u32.totalorder %s1130_s17, %s1126_s29  ;;  %p1134_p6 = scmp.lt.u32.totalorder %s1126_s29, %s1415_s23 }
 0x25a   : > { %p1128_p8 = pnand %p1127_p5, %p1471_p11 }
 0x25b   : > { %p1133_p3 = por %p1132_p1, %p1131_p0 }
 0x25c   : > { %p1129_p9 = pneg %p1128_p8 }
 0x25d   : > { %p1135_p12 = por %p1134_p6, %p1133_p3 }
 0x25f   : > { %p1136_p13 = pnand %p1135_p12, %p1129_p9 }
 0x261   : > { %1139 = shalt.err (!%p1136_p13)
}
 0x262   : > { %996 = dma.vmem_to_hbm [thread:$0]  (%p1471_p11), %s1417_s30, 384, %s1415_s23, %s868_s16  }
 0x263 PF: > { %s894_s22 = sand.u32 1, %s1166_s12   ;;  %p1472_p7 = scmp.ne.s32.totalorder %s1467_s25, 0 }
 0x264   : > { %p1473_p10 = scmp.ge.s32.totalorder %s1178_s15, 2  ;;  %s895_s26 = scalar_lea.sflag [#allocation6], %s894_s22 }
 0x266   : > { %p1003_p2 = pnand %p1473_p10, %p1472_p7 }
 0x268   : > { %1161 = dma.done.wait (!%p1003_p2), %s895_s26, 384  }
 0x269   : > { %1163 = vsyncadd (!%p1003_p2), %s895_s26, 4294966912  ;;  %p16_p4 = scmp.ge.s32.totalorder %s1255_s18, 4   ;;  %s1474_s12 = smov %s1170_s13 }
 0x26a   : > { %s1475_s13 = smov %s1174_s14  ;;  %s1476_s14 = smov %s1267_s21 }
 0x26b   : > { %s1477_s15 = smov %s1255_s18  ;;  %18 = sbr.rel (!%p16_p4) target bundleno = 5 (0x5), region = 77 }
 0x272   :  { %900 = vsyncpa [#allocation5], 1 }
 0x273   :  { %902 = vsyncpa [#allocation5 + $0x1], 1 }
 0x274   :  { %903 = vsyncpa [#allocation6], 1 }
 0x275   :  { %905 = vsyncpa [#allocation6 + $0x1], 1 }

</bundles_post_ra>
